<compile_context>
chip_gen: v6e
topology: v6e:2x2x1
jax: 0.10.0
libtpu: 0.0.40
codegen_flags: <defaults>
</compile_context>

<pallas_src>
import functools

import jax
import jax.numpy as jnp
from jax import lax
from jax.experimental import pallas as pl
from jax.experimental.pallas import tpu as pltpu

_LANE = 128


@functools.lru_cache(maxsize=1)
def _tpu_generation():
    """Best-effort TPU generation detection (0 = unknown / not a TPU backend)."""
    try:
        dev = jax.devices()[0]
        if dev.platform != "tpu":
            return 0
        kind = dev.device_kind.lower()
    except Exception:
        return 0
    if "v7" in kind or "tpu7" in kind or "7x" in kind:
        return 7
    if "v6" in kind:
        return 6
    if "v5" in kind:
        return 5
    if "v4" in kind:
        return 4
    return 0


def _auto_config():
    """Generation-aware block size / VMEM budget / grid-depth / pow-path defaults.

    * Bandwidth-bound streaming reduce -> amortize the ~0.35 us grid-step overhead with
      multi-MiB blocks, sized to each generation's physical VMEM (v5e/v6e: 128 MiB,
      v7x: 64 MiB).  Double-buffered footprint is ~4x block_bytes on the 4-D branch.
    * v7x: keep >= 8 grid steps so both TensorCores get work and the pipeline can hide
      prologue/epilogue; enable the bf16 EUP focal-weight path by default there (the
      f32 exp/log path can make the single EUP the binding unit on v7x).
    * v5e: ~2 MiB blocks already sit near its HBM roofline; no bf16 VPU/EUP -> exact f32.
    """
    gen = _tpu_generation()
    if gen >= 7:
        return dict(block_bytes=4 << 20, vmem_limit=40 << 20, min_steps=8,
                    approx_pow_default=True)
    if gen == 6:
        return dict(block_bytes=8 << 20, vmem_limit=64 << 20, min_steps=4,
                    approx_pow_default=False)
    if gen == 5:
        return dict(block_bytes=2 << 20, vmem_limit=32 << 20, min_steps=4,
                    approx_pow_default=False)
    return dict(block_bytes=4 << 20, vmem_limit=32 << 20, min_steps=4,
                approx_pow_default=False)


def _int_pow(v, e):
    """v**e for a positive integer e as a VPU multiply chain (no transcendentals)."""
    out = None
    while e > 0:
        if e & 1:
            out = v if out is None else out * v
        e >>= 1
        if e:
            v = v * v
    return out


def _focal_loss_kernel(x_ref, t_ref, a_ref, o_ref, *,
                       gamma, hw, tile_hw, chunk, need_mask, approx_pow):
    # x_ref: (1, C, tile_hw)  input probabilities for one (batch, hw-block) tile
    # t_ref: (1, C, tile_hw)  (4-D target) or (1, 1, tile_hw) (3-D target)
    # a_ref: (1, C, 1)        per-class alpha weights
    # o_ref: (1, 8, 128)      per-tile partial sum (only element [0, 0, 0] is non-zero)
    c = x_ref.shape[1]
    alpha = a_ref[...].astype(jnp.float32)              # (1, C, 1), hoisted out of loop
    n_chunks = tile_hw // chunk                          # static, exact by construction

    g = float(gamma)
    use_int_pow = (g != 0.0) and g.is_integer() and (0.0 < g <= 32.0)

    def body(i, acc):
        start = i * chunk
        if chunk % _LANE == 0:
            start = pl.multiple_of(start, _LANE)
        x = x_ref[:, :, pl.ds(start, chunk)].astype(jnp.float32)   # (1, C, chunk)
        t = t_ref[:, :, pl.ds(start, chunk)].astype(jnp.float32)   # (1, C|1, chunk)

        class_pt = jnp.clip(x * t, 0.0001, 1.0)
        class_neg_pt = jnp.clip((1.0 - x) * t, 0.0001, 1.0)

        if g == 0.0:
            focal = None                                  # pow(., 0) == 1
        elif use_int_pow:
            focal = _int_pow(class_neg_pt, int(g))        # exact, VPU multiplies only
        elif approx_pow:
            # bf16 EUP path (v6e/v7x have bf16 EUP): exp(g*log(x)) in bf16 keeps the
            # single EUP from becoming the binding unit; ~0.5-1% aggregate error.
            cn = class_neg_pt.astype(jnp.bfloat16)
            gb = jnp.asarray(g, dtype=jnp.bfloat16)
            focal = jnp.exp(gb * jnp.log(cn)).astype(jnp.float32)
        else:
            focal = jnp.power(class_neg_pt, jnp.float32(g))  # exact f32 exp/log path

        log_pt = jnp.log(class_pt)
        loss = alpha * log_pt if focal is None else alpha * (focal * log_pt)
        loss = -loss                                       # (1, C, chunk)

        if need_mask:
            # CORRECTNESS NOTE: lanes past H*W of the last block are read OOB-padded
            # garbage that has already flowed through clip/log above; they are only
            # zeroed HERE.  Keep this mask as the last op before the accumulate — any
            # reduction or rescale inserted before it would silently break.
            hw_idx = (pl.program_id(1) * tile_hw + i * chunk
                      + lax.broadcasted_iota(jnp.int32, loss.shape, 2))
            loss = jnp.where(hw_idx < hw, loss, 0.0)

        return acc + loss

    acc0 = jnp.zeros((1, c, chunk), jnp.float32)
    acc = lax.fori_loop(0, n_chunks, body, acc0, unroll=(n_chunks <= 4))
    partial = jnp.sum(acc)   # one small cross-lane reduce per multi-MiB tile

    # Single lane-dense (8, 128) store; only [0, 0, 0] carries the partial sum so the
    # host-side jnp.sum over all partial blocks is exact.  (Cost: a handful of VPU ops
    # + one 4 KiB writeback per multi-MiB tile — negligible.)
    sub = lax.broadcasted_iota(jnp.int32, o_ref.shape, 1)
    lane = lax.broadcasted_iota(jnp.int32, o_ref.shape, 2)
    o_ref[...] = jnp.where((sub == 0) & (lane == 0), partial, jnp.float32(0.0))


def _pick_tiling(hw, c, itemsize, block_bytes, n, min_steps):
    """Choose (tile_hw, chunk).

    chunk:   inner compute chunk (multiple of 128 lanes), capped so one (1, C, chunk)
             f32 temporary is <= ~16 KiB (<= 4 vregs) — the ~8-10 live temporaries in
             the loop body then fit the 64-vreg file without spilling.
    tile_hw: DMA block (multiple of chunk), targeting ~block_bytes per input stream,
             but capped so the grid keeps >= min_steps steps (pipeline depth + v7x
             megacore sharding), best-effort.
    """
    if hw < _LANE:
        return hw, hw     # single full-extent block (lane dim equals the array dim)
    chunk_cap_c = max(_LANE, (16 * 1024 // max(c * 4, 1)) // _LANE * _LANE)
    hw_lanes = pl.cdiv(hw, _LANE) * _LANE
    chunk = max(_LANE, min(8 * _LANE, chunk_cap_c, hw_lanes))
    # DMA block: a multiple of `chunk`, targeting ~block_bytes for the widest stream.
    want = max(chunk, (block_bytes // max(c * itemsize, 1)) // chunk * chunk)
    tile_hw = min(want, pl.cdiv(hw, chunk) * chunk)
    # Keep enough grid steps for pipelining / megacore sharding (best-effort).
    jb_min = max(1, pl.cdiv(min_steps, max(n, 1)))
    if jb_min > 1:
        cap = max(chunk, pl.cdiv(pl.cdiv(hw, jb_min), chunk) * chunk)
        tile_hw = min(tile_hw, cap)
    return tile_hw, chunk


@functools.partial(jax.jit,
                   static_argnames=("gamma", "size_average", "block_bytes", "approx_pow"))
def focal_loss(x, target, alpha, gamma=0.0, size_average=True,
               block_bytes=None, approx_pow=None):
    """Pallas implementation of FocalLoss.forward; returns a scalar.

    block_bytes: target DMA block bytes per input stream (None = generation-aware auto).
    approx_pow : use the bf16 EUP path for the non-integer-gamma focal weight
                 (None = auto: enabled only on v7x).  Integer gamma is always exact.
    """
    cfg = _auto_config()
    if block_bytes is None:
        block_bytes = cfg["block_bytes"]
    if approx_pow is None:
        approx_pow = cfg["approx_pow_default"]

    n, c = x.shape[0], x.shape[1]
    hw = 1
    for d in x.shape[2:]:
        hw *= int(d)

    # input stays in its native (N, C, H*W) layout — no transpose copy, H*W on lanes.
    x_v = x.reshape(n, c, hw)

    if target.ndim == 4:
        # PyTorch (bug-compatibly) pairs input read in NHWC-flat order with target read
        # in raw NCHW-flat order.  With x kept native/lane-dense, enforcing that exact
        # pairing requires presenting target as (N, C, HW) in "NHWC-read" order, i.e.
        # this transpose.  PERF NOTE: this is a full extra HBM read+write of `target`
        # OUTSIDE the kernel (~+50% HBM traffic on the 4-D branch); it cannot be removed
        # without an in-kernel transpose or changing the (bug-compatible) pairing, so
        # include it when benchmarking the 4-D path end-to-end.
        t_v = target.reshape(n, hw, c).transpose(0, 2, 1)
        t_rows = c
    elif target.ndim == 3:
        # (N, H, W) -> (N, 1, HW); class broadcast happens inside the kernel.
        # Zero host-side copies on this branch.
        t_v = target.reshape(n, 1, hw)
        t_rows = 1
    else:
        raise ValueError("target shape error")

    alpha_arr = jnp.broadcast_to(
        jnp.asarray(alpha, jnp.float32).reshape(-1), (c,)).reshape(1, c, 1)

    itemsize = max(jnp.dtype(x.dtype).itemsize, jnp.dtype(t_v.dtype).itemsize)
    tile_hw, chunk = _pick_tiling(hw, c, itemsize, block_bytes, n, cfg["min_steps"])
    jb = pl.cdiv(hw, tile_hw)
    need_mask = (jb * tile_hw != hw)

    kernel = functools.partial(
        _focal_loss_kernel,
        gamma=float(gamma), hw=hw, tile_hw=tile_hw, chunk=chunk,
        need_mask=need_mask, approx_pow=bool(approx_pow))

    partials = pl.pallas_call(
        kernel,
        out_shape=jax.ShapeDtypeStruct((n * jb, 8, _LANE), jnp.float32),
        grid_spec=pltpu.PrefetchScalarGridSpec(
            num_scalar_prefetch=0,
            grid=(n, jb),
            in_specs=[
                pl.BlockSpec((1, c, tile_hw), lambda i, j: (i, 0, j)),
                pl.BlockSpec((1, t_rows, tile_hw), lambda i, j: (i, 0, j)),
                pl.BlockSpec((1, c, 1), lambda i, j: (0, 0, 0)),
            ],
            out_specs=pl.BlockSpec((1, 8, _LANE), lambda i, j: (i * jb + j, 0, 0)),
        ),
        compiler_params=pltpu.CompilerParams(
            dimension_semantics=("parallel", "parallel"),
            vmem_limit_bytes=cfg["vmem_limit"],
        ),
    )(x_v, t_v, alpha_arr)

    total = jnp.sum(partials)
    if size_average:
        total = total / jnp.float32(n * hw * c)
    return total


def focal_loss_ref(x, target, alpha, gamma=0.0, size_average=True):
    """Pure-JAX reference mirroring the PyTorch forward exactly."""
    n, c = x.shape[0], x.shape[1]
    xi = x.reshape(n, c, -1).transpose(0, 2, 1).reshape(-1, c)
    if target.ndim == 4:
        ti = target.reshape(-1, c).astype(jnp.float32)
    else:
        ti = target.reshape(-1, 1).astype(jnp.float32)
    class_pt = jnp.clip(xi * ti, 0.0001, 1.0)
    class_neg_pt = jnp.clip((1.0 - xi) * ti, 0.0001, 1.0)
    a = jnp.asarray(alpha, jnp.float32)
    loss = -1.0 * a * jnp.power(class_neg_pt, jnp.float32(gamma)) * jnp.log(class_pt)
    return loss.mean() if size_average else loss.sum()


if __name__ == "__main__":
    key = jax.random.PRNGKey(0)
    k_x, k_t = jax.random.split(key)

    N, C, H, W = 2, 4, 16, 16
    # probability-like inputs in (0, 1), matching typical FocalLoss usage
    x = jax.random.uniform(k_x, (N, C, H, W), dtype=jnp.float32)
    alpha = [0.25, 0.5, 0.75, 1.0]  # per-class weights (len C)

    # ---- 4-D one-hot target branch, integer gamma (VPU multiply-chain path) ----
    cls = jax.random.randint(k_t, (N, H, W), 0, C)
    target4 = jax.nn.one_hot(cls, C, dtype=jnp.float32).transpose(0, 3, 1, 2)  # NCHW
    out4 = jax.block_until_ready(
        focal_loss(x, target4, alpha, gamma=2.0, size_average=True, approx_pow=False))
    ref4 = focal_loss_ref(x, target4, alpha, gamma=2.0, size_average=True)
    assert jnp.allclose(out4, ref4, rtol=1e-5, atol=1e-6), (out4, ref4)

    # ---- 3-D target branch, non-integer gamma (exact f32 pow path), sum reduction ----
    target3 = jax.random.randint(jax.random.PRNGKey(1), (N, H, W), 0, 2).astype(jnp.float32)
    out3 = jax.block_until_ready(
        focal_loss(x, target3, alpha, gamma=1.5, size_average=False, approx_pow=False))
    ref3 = focal_loss_ref(x, target3, alpha, gamma=1.5, size_average=False)
    assert jnp.allclose(out3, ref3, rtol=1e-5, atol=1e-6), (out3, ref3)

    # ---- bf16 EUP fast-pow path (default on v7x); exercised where bf16 EUP exists ----
    if _tpu_generation() >= 6:
        out3a = jax.block_until_ready(
            focal_loss(x, target3, alpha, gamma=1.5, size_average=False, approx_pow=True))
        assert jnp.allclose(out3a, ref3, rtol=5e-2), (out3a, ref3)

    print("KERNEL_OK")
</pallas_src>

<mosaic_0001>
module attributes {stable_mosaic.version = 11 : i64} {
  func.func @_focal_loss_kernel(%arg0: i32, %arg1: i32, %arg2: memref<1x4x256xf32, #tpu.memory_space<vmem>>, %arg3: memref<1x4x256xf32, #tpu.memory_space<vmem>>, %arg4: memref<1x4x1xf32, #tpu.memory_space<vmem>>, %arg5: memref<1x8x128xf32, #tpu.memory_space<vmem>>) attributes {dimension_semantics = [#tpu.dimension_semantics<parallel>, #tpu.dimension_semantics<parallel>], iteration_bounds = array<i64: 2, 1>, scalar_prefetch = 0 : i64, scratch_operands = 0 : i64, tpu.core_type = #tpu.core_type<tc>, window_params = [{transform_indices = @transform_0, window_bounds = array<i64: 1, 4, 256>}, {transform_indices = @transform_1, window_bounds = array<i64: 1, 4, 256>}, {pipeline_mode = #tpu.pipeline_mode<synchronous>, transform_indices = @transform_2, window_bounds = array<i64: 1, 4, 1>}, {transform_indices = @transform_3, window_bounds = array<i64: 1, 8, 128>}]} {
    %c0 = arith.constant 0 : index
    %c0_0 = arith.constant 0 : index
    %c0_1 = arith.constant 0 : index
    %0 = vector.load %arg4[%c0, %c0_0, %c0_1] : memref<1x4x1xf32, #tpu.memory_space<vmem>>, vector<1x4x1xf32>
    %cst = arith.constant 0.000000e+00 : f32
    %1 = vector.broadcast %cst : f32 to vector<1x4x256xf32>
    %c0_i32 = arith.constant 0 : i32
    %c256_i32 = arith.constant 256 : i32
    %2 = arith.muli %c0_i32, %c256_i32 : i32
    %3 = tpu.assume_multiple %2, 128 : i32
    %c0_2 = arith.constant 0 : index
    %c0_3 = arith.constant 0 : index
    %4 = arith.index_cast %3 : i32 to index
    %5 = vector.load %arg2[%c0_2, %c0_3, %4] : memref<1x4x256xf32, #tpu.memory_space<vmem>>, vector<1x4x256xf32>
    %c0_4 = arith.constant 0 : index
    %c0_5 = arith.constant 0 : index
    %6 = arith.index_cast %3 : i32 to index
    %7 = vector.load %arg3[%c0_4, %c0_5, %6] : memref<1x4x256xf32, #tpu.memory_space<vmem>>, vector<1x4x256xf32>
    %8 = arith.mulf %5, %7 : vector<1x4x256xf32>
    %cst_6 = arith.constant 9.99999974E-5 : f32
    %cst_7 = arith.constant 1.000000e+00 : f32
    %9 = vector.broadcast %cst_6 : f32 to vector<1x4x256xf32>
    %10 = arith.maximumf %9, %8 : vector<1x4x256xf32>
    %11 = vector.broadcast %cst_7 : f32 to vector<1x4x256xf32>
    %12 = arith.minimumf %11, %10 : vector<1x4x256xf32>
    %cst_8 = arith.constant 1.000000e+00 : f32
    %13 = vector.broadcast %cst_8 : f32 to vector<1x4x256xf32>
    %14 = arith.subf %13, %5 : vector<1x4x256xf32>
    %15 = arith.mulf %14, %7 : vector<1x4x256xf32>
    %cst_9 = arith.constant 9.99999974E-5 : f32
    %cst_10 = arith.constant 1.000000e+00 : f32
    %16 = vector.broadcast %cst_9 : f32 to vector<1x4x256xf32>
    %17 = arith.maximumf %16, %15 : vector<1x4x256xf32>
    %18 = vector.broadcast %cst_10 : f32 to vector<1x4x256xf32>
    %19 = arith.minimumf %18, %17 : vector<1x4x256xf32>
    %20 = arith.mulf %19, %19 : vector<1x4x256xf32>
    %21 = math.log %12 : vector<1x4x256xf32>
    %22 = arith.mulf %20, %21 : vector<1x4x256xf32>
    %23 = vector.broadcast %0 : vector<1x4x1xf32> to vector<1x4x256xf32>
    %24 = arith.mulf %23, %22 : vector<1x4x256xf32>
    %cst_11 = arith.constant 0.000000e+00 : f32
    %25 = vector.broadcast %cst_11 : f32 to vector<1x4x256xf32>
    %26 = arith.subf %25, %24 : vector<1x4x256xf32>
    %27 = arith.addf %1, %26 : vector<1x4x256xf32>
    %c1_i32 = arith.constant 1 : i32
    %28 = vector.shape_cast %27 : vector<1x4x256xf32> to vector<1x1x4x256xf32>
    %cst_12 = arith.constant dense<0.000000e+00> : vector<1xf32>
    %29 = vector.multi_reduction <add>, %28, %cst_12 [1, 2, 3] : vector<1x1x4x256xf32> to vector<1xf32>
    %30 = vector.shape_cast %29 : vector<1xf32> to vector<1x1x1x1xf32>
    %31 = vector.extract %30[0, 0, 0, 0] : f32 from vector<1x1x1x1xf32>
    %32 = tpu.iota {dimensions = array<i32: 1>} : vector<1x8x128xi32>
    %33 = tpu.iota {dimensions = array<i32: 2>} : vector<1x8x128xi32>
    %c0_i32_13 = arith.constant 0 : i32
    %34 = vector.broadcast %c0_i32_13 : i32 to vector<1x8x128xi32>
    %35 = arith.cmpi eq, %32, %34 : vector<1x8x128xi32>
    %c0_i32_14 = arith.constant 0 : i32
    %36 = vector.broadcast %c0_i32_14 : i32 to vector<1x8x128xi32>
    %37 = arith.cmpi eq, %33, %36 : vector<1x8x128xi32>
    %38 = arith.andi %35, %37 : vector<1x8x128xi1>
    %cst_15 = arith.constant 0.000000e+00 : f32
    %39 = vector.broadcast %31 : f32 to vector<1x8x128xf32>
    %40 = vector.broadcast %cst_15 : f32 to vector<1x8x128xf32>
    %41 = arith.select %38, %39, %40 : vector<1x8x128xi1>, vector<1x8x128xf32>
    %c0_16 = arith.constant 0 : index
    %c0_17 = arith.constant 0 : index
    %c0_18 = arith.constant 0 : index
    %42 = vector.load %arg5[%c0_16, %c0_17, %c0_18] : memref<1x8x128xf32, #tpu.memory_space<vmem>>, vector<1x8x128xf32>
    tpu.vector_store %arg5[%c0_16, %c0_17, %c0_18], %41 {strides = array<i32>} : memref<1x8x128xf32, #tpu.memory_space<vmem>>, vector<1x8x128xf32>,
    return
  }
  func.func @transform_0(%arg0: i32, %arg1: i32) -> (i32, i32, i32) {
    %c0_i32 = arith.constant 0 : i32
    %c0_i32_0 = arith.constant 0 : i32
    return %arg0, %c0_i32, %arg1 : i32, i32, i32
  }
  func.func @transform_1(%arg0: i32, %arg1: i32) -> (i32, i32, i32) {
    %c0_i32 = arith.constant 0 : i32
    %c0_i32_0 = arith.constant 0 : i32
    return %arg0, %c0_i32, %arg1 : i32, i32, i32
  }
  func.func @transform_2(%arg0: i32, %arg1: i32) -> (i32, i32, i32) {
    %c0_i32 = arith.constant 0 : i32
    %c0_i32_0 = arith.constant 0 : i32
    %c0_i32_1 = arith.constant 0 : i32
    %c0_i32_2 = arith.constant 0 : i32
    return %c0_i32, %c0_i32_0, %c0_i32_1 : i32, i32, i32
  }
  func.func @transform_3(%arg0: i32, %arg1: i32) -> (i32, i32, i32) {
    %c1_i32 = arith.constant 1 : i32
    %0 = arith.muli %arg0, %c1_i32 : i32
    %1 = arith.addi %0, %arg1 : i32
    %c0_i32 = arith.constant 0 : i32
    %c0_i32_0 = arith.constant 0 : i32
    %c0_i32_1 = arith.constant 0 : i32
    return %1, %c0_i32, %c0_i32_0 : i32, i32, i32
  }
}

</mosaic_0001>

<bundles_post_ra>
// kernel: focal_loss.1
= control target key start
LH: loop header
LB: loop body
LE: loop exit
PB: predicated region body
PF: predicated region fallthrough
CT: control target
= control target key end

     0   :  { %s467_s12 = smov 0   ;;  %s469_s13 = smov 0   ;;  %s511_s0 = inlined_call_operand.vmem [shape: f32[2,4,256], index: 0, kind: input, shape index: {}]   ;;  %s512_s1 = inlined_call_operand.vmem [shape: f32[2,4,256], index: 1, kind: input, shape index: {}]   ;;  %s513_s2 = inlined_call_operand.vmem [shape: f32[1,4,1], index: 2, kind: input, shape index: {}]   ;;  %s514_s3 = inlined_call_operand.vmem [shape: f32[2,8,128], index: 3, kind: output, shape index: {}]  }
   0x1   :  { %s471_s14 = smov 0  }
   0x2 LB: > { %s25_s15 = sadd.s32 1, %s440_s13  ;;  %p382_p0 = scmp.ge.s32.totalorder %s444_s14, 1  ;;  %s444_s14 = sphi %s471_s14, %s13_s14   ;;  %s440_s13 = sphi %s469_s13, %s516_s13   ;;  %s436_s12 = sphi %s467_s12, %s515_s12  }
   0x3   : > { %p27_p1 = scmp.ge.s32.totalorder %s25_s15, 2  ;;  %p175_p2 = scmp.lt.s32.totalorder %s444_s14, 3 }
   0x5   : > { %s518_s15 = smov (%p27_p1, %s25_s15), 0  ;;  %p176_p3 = pnand %p382_p0, %p175_p2 }
   0x6   : > { %p213_p4 = scmp.lt.s32.totalorder (!%p176_p3), %s436_s12, 1 }
   0x7   : > { %179 = sbr.rel (%p176_p3) target bundleno = 348 (0x15c), region = 32 }
   0xc   : > { %v238_v0 = vld [vmem:[%s513_s2] sm:$0xf]  ;;  %v446_v1 = vmov 0   ;;  %s520_s12 = smov (!%p213_p4, %s436_s12), 1  ;;  %vm266_vm0 = vcmask 1043456   ;;  %v279_v31 = vlaneseq }
   0xd   : > { %419 = vset.pattern.permute.xlu0 %v446_v1  ;;  %s488_s18 = sshll.u32 %s520_s12, 3 }
   0xe   : > { %254 = vperm.xlu0 %419, %v238_v0   ;;  %s220_s21 = scalar_lea.vmem %s511_s0, %s488_s18  ;;  %s230_s24 = scalar_lea.vmem %s512_s1, %s488_s18  ;;  %v280_v32 = vshrl.u32 %v279_v31, 7  ;;  %v282_v33 = vand.u32 127, %v279_v31 }
   0xf   : > { %v239_v2 = vld [vmem:[%s220_s21] sm:$0xff]  ;;  %s236_s27 = scalar_lea.vmem %s514_s3, %s488_s18 }
  0x10   : > { %v240_v3 = vld [vmem:[%s230_s24] sm:$0xff]  ;;  %v244_v7 = vsub.f32 1.0, %v239_v2  ;;  %vm283_vm1 = vcmp.eq.s32.totalorder %v280_v32, 0  ;;  %vm284_vm2 = vcmp.eq.s32.totalorder %v282_v33, 0 }
  0x11   : > { %v241_v4 = vmul.f32 %v240_v3, %v239_v2  ;;  %vm285_vm3 = vmand %vm283_vm1, %vm284_vm2 }
  0x12   : > { %v245_v8 = vmul.f32 %v244_v7, %v240_v3 }
  0x13   : > { %v242_v5 = vmax.f32 %v241_v4, 0.0001 }
  0x14   : > { %v246_v9 = vmax.f32 %v245_v8, 0.0001 }
  0x15   : > { %v243_v6 = vmin.f32 %v242_v5, 1.0 }
  0x16   : > { %v247_v10 = vmin.f32 %v246_v9, 1.0 }
  0x17   : > { %420 = vlog2.f32 %v243_v6 }
  0x18   : > { %v248_v12 = vmul.f32 %v247_v10, %v247_v10 }
  0x24   : > { %v421_v11 = vpop.eup %420 }
  0x25   : > { %v250_v13 = vmul.f32 0.6931472, %v421_v11 }
  0x27   : > { %v251_v14 = vmul.f32 %v250_v13, %v248_v12 }
  0x29   : > { %v258_v15 = vcombine.high %v251_v14, %v251_v14 }
  0x89   : > { %v255_v16 = vpop.permute.xlu0 %254 }
  0x8a   : > { %v260_v17 = vmul.f32 %v255_v16, %v251_v14  ;;  %v261_v18 = vmul.f32 %v258_v15, %v255_v16 }
  0x8c   : > { %v262_v19 = vsub.f32 0.0, %v260_v17  ;;  %v263_v20 = vsub.f32 0.0, %v261_v18 }
  0x8e   : > { %v267_v21 = vsel %vm266_vm0, %v262_v19, 0.0  ;;  %v268_v22 = vsel %vm266_vm0, %v263_v20, 0.0 }
  0x8f   : > { %v269_v23 = vadd.f32 %v268_v22, %v267_v21 }
  0x91   : > { %270 = vadd.xlane.f32.xlu0 %v269_v23 }
 0x11a   : > { %v271_v24 = vpop.xlane.xlu0 %270 }
 0x11b   : > { %v272_v25 = vrot.slane %v271_v24, 4 }
 0x11d   : > { %v273_v26 = vadd.f32 %v272_v25, %v271_v24 }
 0x11f   : > { %v274_v27 = vrot.slane %v273_v26, 2 }
 0x121   : > { %v275_v28 = vadd.f32 %v274_v27, %v273_v26 }
 0x123   : > { %v276_v29 = vrot.slane %v275_v28, 1 }
 0x125   : > { %v277_v30 = vadd.f32 %v276_v29, %v275_v28 }
 0x127   : > { %392 = vpush %v277_v30 }
 0x158   : > { %s393_s28 = spop %392 }
 0x159   : > { %v286_v34 = vstv %s393_s28 }
 0x15a   : > { %v287_v35 = vsel %vm285_vm3, %v286_v34, 0.0 }
 0x15b   : > { %288 = vst [vmem:[%s236_s27] sm:$0xff] %v287_v35 }
 0x15c PF: > { %s13_s14 = sadd.s32 1, %s444_s14   ;;  %s515_s12 = smov %s440_s13 }
 0x15d   : > { %p10_p5 = scmp.ge.s32.totalorder %s13_s14, 4   ;;  %s516_s13 = smov %s518_s15 }
 0x15f   :  { %12 = sbr.rel (!%p10_p5) target bundleno = 2 (0x2), region = 65 }

</bundles_post_ra>
